<compile_context>
chip_gen: v7x
topology: tpu7x:2x2x1
jax: 0.10.0
libtpu: 0.0.40
codegen_flags: <defaults>
</compile_context>

<pallas_src>
import jax
import jax.numpy as jnp
import numpy as np
from jax.experimental import pallas as pl
from jax.experimental.pallas import tpu as pltpu


def _vmem_budgets():
    """(working-set budget, scoped-vmem limit) per TPU generation.

    v5e/v6e have 128 MiB VMEM per TensorCore -> bigger tiles; v7x has 64 MiB
    -> conservative.  Falls back to conservative if the query is unavailable."""
    try:
        cap = getattr(pltpu.get_tpu_info(), "vmem_capacity_bytes", None)
    except Exception:
        cap = None
    if cap is not None and cap >= 100 * 1024 * 1024:      # v5e / v6e class
        return 40 * 1024 * 1024, 100 * 1024 * 1024
    return 16 * 1024 * 1024, 48 * 1024 * 1024             # v7x class / unknown


def _pick_batch_tile(B, S, D, h_itemsize, budget_bytes, min_total_steps=4):
    """Pick (TB, padded_B) for the batch grid.

    TB is either the full batch (full-extent blocks are always legal) or a
    multiple of 8 that divides the padded batch, sized so the double-buffered
    working set stays under `budget_bytes` and -- for large batches -- so
    there are >= min_total_steps grid steps (>= 2 per v7x TensorCore)."""
    # Per-batch-row working set: h in (native dtype) + mask in + a + H out
    # (f32), all double-buffered by the BlockSpec pipeline.
    bytes_per_row = 2 * (h_itemsize * S * D + 4 * S + 4 * S + 4 * D)
    cap = max(1, budget_bytes // bytes_per_row)
    # v7x megacore: keep >= min_total_steps grid steps when each step can
    # still hold >= 8 sublane rows.
    if B >= 8 * min_total_steps:
        cap = min(cap, B // min_total_steps)
    if cap >= B:
        return B, B          # single full-batch block (full-extent => legal)
    # Tile the batch: pad B to a sublane multiple, TB = largest multiple of 8
    # <= cap that divides the padded batch (never emits misaligned blocks).
    B_pad = ((B + 7) // 8) * 8
    cap = (max(8, min(cap, B_pad)) // 8) * 8
    tb = 8
    for cand in range(cap, 7, -8):
        if B_pad % cand == 0:
            tb = cand
            break
    # TODO(synk): if a single TB=8 tile already exceeds the VMEM budget (very
    # large S*D on v7x), add an inner pipelined loop over S with a flash-style
    # running max/sum instead of relying on the raised scoped-vmem limit.
    return tb, B_pad


def _interpretation_kernel(h_ref, mask_ref, w_ref, H_ref, a_ref):
    # h_ref:    (TB, S, D)  -- D on lanes, S on sublanes, native dtype
    # mask_ref: (TB, S)     -- f32, S on lanes (lane-dense)
    # w_ref:    (1, D)      -- Linear(hidden, 1) weight row, f32
    # H_ref:    (TB, D)     -- f32
    # a_ref:    (TB, S)     -- f32
    h_dtype = h_ref.dtype
    mask = mask_ref[...]                                       # (TB, S) f32
    w = w_ref[...].astype(h_dtype)                             # (1, D)

    # Linear(hidden, 1) logits minus span mask; elementwise muls in h's
    # native dtype, f32 accumulation.  (Bias omitted: softmax shift
    # invariance => no effect on either output.)
    o = jnp.sum(h_ref[...] * w[None, :, :], axis=-1,
                dtype=jnp.float32) - mask                      # (TB, S)

    # Softmax over the sequence axis (lane reductions), f32 throughout.
    m = jnp.max(o, axis=-1, keepdims=True)                     # (TB, 1)
    e = jnp.exp(o - m)                                         # (TB, S)
    denom = jnp.sum(e, axis=-1, keepdims=True)                 # (TB, 1)
    a = e * pl.reciprocal(denom, approx=False)                 # (TB, S)

    # Weighted sum over sequence; h is re-read so no promoted copy of the
    # whole tile stays live across the softmax.  f32 accumulation.
    H = jnp.sum(a.astype(h_dtype)[:, :, None] * h_ref[...], axis=1,
                dtype=jnp.float32)                             # (TB, D)

    H_ref[...] = H
    a_ref[...] = a


def interpretation_forward(h_ij, span_masks, w, b=None, *,
                           cast_h_to_bf16=False,
                           vmem_budget_bytes=None,
                           vmem_limit_bytes=None):
    """Pallas forward for InterpretationModel.

    h_ij: (B, S, D), span_masks: (B, S), w: (D, 1) (= Linear(hidden,1).weight.T),
    b: (1,) or None.  The bias is mathematically inert (softmax shift
    invariance) and is intentionally ignored.  Set cast_h_to_bf16=True to
    halve the dominant HBM stream (accumulation stays f32).
    Returns (H: (B, D) f32, a_ij: (B, S) f32)."""
    del b  # dead: softmax(o + c) == softmax(o); H depends only on a & h
    B, S, D = h_ij.shape

    if cast_h_to_bf16:
        h_ij = h_ij.astype(jnp.bfloat16)        # >95% of HBM bytes -> halved
    span_masks = span_masks.astype(jnp.float32)
    w_row = jnp.reshape(w, (1, D)).astype(jnp.float32)

    # Lane padding for large, non-multiple-of-128 sequence lengths keeps the
    # (TB, S) mask / a_ij blocks lane-dense (unmasked vst) and the softmax on
    # full vregs.  Padded positions get a huge mask -> ~0 attention.
    S_p = S
    if S >= 128 and S % 128 != 0:
        S_p = ((S + 127) // 128) * 128
        h_ij = jnp.pad(h_ij, ((0, 0), (0, S_p - S), (0, 0)))
        span_masks = jnp.pad(span_masks, ((0, 0), (0, S_p - S)),
                             constant_values=1e9)

    budget, limit = _vmem_budgets()
    if vmem_budget_bytes is not None:
        budget = vmem_budget_bytes
    if vmem_limit_bytes is not None:
        limit = vmem_limit_bytes

    TB, B_p = _pick_batch_tile(B, S_p, D, jnp.dtype(h_ij.dtype).itemsize,
                               budget)
    if B_p > B:   # pad batch to a sublane multiple; padded rows sliced off
        h_ij = jnp.pad(h_ij, ((0, B_p - B), (0, 0), (0, 0)))
        span_masks = jnp.pad(span_masks, ((0, B_p - B), (0, 0)))

    H, a_ij = pl.pallas_call(
        _interpretation_kernel,
        out_shape=(
            jax.ShapeDtypeStruct((B_p, D), jnp.float32),
            jax.ShapeDtypeStruct((B_p, S_p), jnp.float32),
        ),
        grid_spec=pltpu.PrefetchScalarGridSpec(
            num_scalar_prefetch=0,
            grid=(B_p // TB,),
            in_specs=[
                # h: the fat, bandwidth-dominant stream.  If a v5e profile
                # shows exposed DMA at this block size, consider
                # pipeline_mode=pl.Buffered(3) here.
                pl.BlockSpec((TB, S_p, D), lambda i: (i, 0, 0)),
                pl.BlockSpec((TB, S_p), lambda i: (i, 0)),     # span_masks
                pl.BlockSpec((1, D), lambda i: (0, 0)),        # weight row
            ],
            out_specs=[
                pl.BlockSpec((TB, D), lambda i: (i, 0)),       # H
                pl.BlockSpec((TB, S_p), lambda i: (i, 0)),     # a_ij
            ],
        ),
        compiler_params=pltpu.CompilerParams(
            dimension_semantics=("parallel",),
            vmem_limit_bytes=limit,
        ),
    )(h_ij, span_masks, w_row)

    return H[:B], a_ij[:B, :S]


def _reference(h_ij, span_masks, w, b):
    # Pure-JAX reference mirroring the PyTorch module (INCLUDING the bias,
    # demonstrating that dropping it in the kernel changes nothing).
    o = jnp.einsum("bsd,do->bso", h_ij, w)[..., 0] + b[0]   # (B, S)
    o = o - span_masks
    a = jax.nn.softmax(o, axis=1)
    H = jnp.sum(a[..., None] * h_ij, axis=1)
    return H, a


if __name__ == "__main__":
    B, S, D = 2, 8, 32    # batch=2, seq=8, hidden=32

    key = jax.random.PRNGKey(0)
    k_h, k_m, k_w, k_b = jax.random.split(key, 4)

    h_ij = jax.random.normal(k_h, (B, S, D), dtype=jnp.float32)
    # span_masks: 0 where allowed, large positive where masked out.
    span_masks = jnp.where(
        jax.random.uniform(k_m, (B, S)) > 0.7, 1e4, 0.0).astype(jnp.float32)

    # Deterministic Linear(hidden, 1) params (uniform(-1/sqrt(D), 1/sqrt(D))).
    bound = 1.0 / np.sqrt(D)
    w = jax.random.uniform(k_w, (D, 1), minval=-bound, maxval=bound,
                           dtype=jnp.float32)
    b = jax.random.uniform(k_b, (1,), minval=-bound, maxval=bound,
                           dtype=jnp.float32)

    # 1) f32 path, strict tolerance.
    H, a_ij = interpretation_forward(h_ij, span_masks, w, b)
    jax.block_until_ready((H, a_ij))
    H_ref, a_ref = _reference(h_ij, span_masks, w, b)
    np.testing.assert_allclose(np.asarray(H), np.asarray(H_ref),
                               rtol=1e-5, atol=1e-5)
    np.testing.assert_allclose(np.asarray(a_ij), np.asarray(a_ref),
                               rtol=1e-5, atol=1e-5)

    # 2) Batch-tiling path: odd batch + tiny budget forces TB=8, padded B,
    #    multi-step grid; still exact in f32.
    B2 = 20
    k_h2, k_m2 = jax.random.split(jax.random.PRNGKey(1), 2)
    h2 = jax.random.normal(k_h2, (B2, S, D), dtype=jnp.float32)
    m2 = jnp.where(jax.random.uniform(k_m2, (B2, S)) > 0.7, 1e4,
                   0.0).astype(jnp.float32)
    H2, a2 = interpretation_forward(h2, m2, w, b, vmem_budget_bytes=4096)
    jax.block_until_ready((H2, a2))
    H2_ref, a2_ref = _reference(h2, m2, w, b)
    np.testing.assert_allclose(np.asarray(H2), np.asarray(H2_ref),
                               rtol=1e-5, atol=1e-5)
    np.testing.assert_allclose(np.asarray(a2), np.asarray(a2_ref),
                               rtol=1e-5, atol=1e-5)

    # 3) bf16-h fast path (halves HBM traffic); loose tolerance vs f32 ref.
    H3, a3 = interpretation_forward(h_ij, span_masks, w, b,
                                    cast_h_to_bf16=True)
    jax.block_until_ready((H3, a3))
    np.testing.assert_allclose(np.asarray(H3), np.asarray(H_ref),
                               rtol=1e-1, atol=5e-2)
    np.testing.assert_allclose(np.asarray(a3), np.asarray(a_ref),
                               rtol=1e-1, atol=5e-2)

    print("KERNEL_OK")
</pallas_src>

<mosaic_0001>
module attributes {stable_mosaic.version = 11 : i64} {
  func.func @_interpretation_kernel(%arg0: i32, %arg1: memref<2x8x32xf32, #tpu.memory_space<vmem>>, %arg2: memref<2x8xf32, #tpu.memory_space<vmem>>, %arg3: memref<1x32xf32, #tpu.memory_space<vmem>>, %arg4: memref<2x32xf32, #tpu.memory_space<vmem>>, %arg5: memref<2x8xf32, #tpu.memory_space<vmem>>) attributes {dimension_semantics = [#tpu.dimension_semantics<parallel>], iteration_bounds = array<i64: 1>, scalar_prefetch = 0 : i64, scratch_operands = 0 : i64, tpu.core_type = #tpu.core_type<tc>, window_params = [{transform_indices = @transform_0, window_bounds = array<i64: 2, 8, 32>}, {transform_indices = @transform_1, window_bounds = array<i64: 2, 8>}, {pipeline_mode = #tpu.pipeline_mode<synchronous>, transform_indices = @transform_2, window_bounds = array<i64: 1, 32>}, {transform_indices = @transform_3, window_bounds = array<i64: 2, 32>}, {transform_indices = @transform_4, window_bounds = array<i64: 2, 8>}]} {
    %c0 = arith.constant 0 : index
    %c0_0 = arith.constant 0 : index
    %0 = vector.load %arg2[%c0, %c0_0] : memref<2x8xf32, #tpu.memory_space<vmem>>, vector<2x8xf32>
    %c0_1 = arith.constant 0 : index
    %c0_2 = arith.constant 0 : index
    %1 = vector.load %arg3[%c0_1, %c0_2] : memref<1x32xf32, #tpu.memory_space<vmem>>, vector<1x32xf32>
    %c0_3 = arith.constant 0 : index
    %c0_4 = arith.constant 0 : index
    %c0_5 = arith.constant 0 : index
    %2 = vector.load %arg1[%c0_3, %c0_4, %c0_5] : memref<2x8x32xf32, #tpu.memory_space<vmem>>, vector<2x8x32xf32>
    %3 = vector.shape_cast %1 : vector<1x32xf32> to vector<1x1x32xf32>
    %4 = vector.broadcast %3 : vector<1x1x32xf32> to vector<2x8x32xf32>
    %5 = arith.mulf %2, %4 : vector<2x8x32xf32>
    %cst = arith.constant dense<0.000000e+00> : vector<2x8xf32>
    %6 = vector.multi_reduction <add>, %5, %cst [2] : vector<2x8x32xf32> to vector<2x8xf32>
    %7 = arith.subf %6, %0 : vector<2x8xf32>
    %cst_6 = arith.constant dense<0xFF800000> : vector<2xf32>
    %8 = vector.multi_reduction <maximumf>, %7, %cst_6 [1] : vector<2x8xf32> to vector<2xf32>
    %9 = vector.shape_cast %8 : vector<2xf32> to vector<2x1xf32>
    %10 = vector.broadcast %9 : vector<2x1xf32> to vector<2x8xf32>
    %11 = arith.subf %7, %10 : vector<2x8xf32>
    %12 = math.exp %11 : vector<2x8xf32>
    %cst_7 = arith.constant dense<0.000000e+00> : vector<2xf32>
    %13 = vector.multi_reduction <add>, %12, %cst_7 [1] : vector<2x8xf32> to vector<2xf32>
    %14 = vector.shape_cast %13 : vector<2xf32> to vector<2x1xf32>
    %15 = tpu.reciprocal %14 : vector<2x1xf32> -> vector<2x1xf32>
    %16 = vector.broadcast %15 : vector<2x1xf32> to vector<2x8xf32>
    %17 = arith.mulf %12, %16 : vector<2x8xf32>
    %18 = vector.shape_cast %17 : vector<2x8xf32> to vector<2x8x1xf32>
    %c0_8 = arith.constant 0 : index
    %c0_9 = arith.constant 0 : index
    %c0_10 = arith.constant 0 : index
    %19 = vector.load %arg1[%c0_8, %c0_9, %c0_10] : memref<2x8x32xf32, #tpu.memory_space<vmem>>, vector<2x8x32xf32>
    %20 = vector.broadcast %18 : vector<2x8x1xf32> to vector<2x8x32xf32>
    %21 = arith.mulf %20, %19 : vector<2x8x32xf32>
    %cst_11 = arith.constant dense<0.000000e+00> : vector<2x32xf32>
    %22 = vector.multi_reduction <add>, %21, %cst_11 [1] : vector<2x8x32xf32> to vector<2x32xf32>
    %c0_12 = arith.constant 0 : index
    %c0_13 = arith.constant 0 : index
    %23 = vector.load %arg4[%c0_12, %c0_13] : memref<2x32xf32, #tpu.memory_space<vmem>>, vector<2x32xf32>
    tpu.vector_store %arg4[%c0_12, %c0_13], %22 {strides = array<i32>} : memref<2x32xf32, #tpu.memory_space<vmem>>, vector<2x32xf32>,
    %c0_14 = arith.constant 0 : index
    %c0_15 = arith.constant 0 : index
    %24 = vector.load %arg5[%c0_14, %c0_15] : memref<2x8xf32, #tpu.memory_space<vmem>>, vector<2x8xf32>
    tpu.vector_store %arg5[%c0_14, %c0_15], %17 {strides = array<i32>} : memref<2x8xf32, #tpu.memory_space<vmem>>, vector<2x8xf32>,
    return
  }
  func.func @transform_0(%arg0: i32) -> (i32, i32, i32) {
    %c0_i32 = arith.constant 0 : i32
    %c0_i32_0 = arith.constant 0 : i32
    %c0_i32_1 = arith.constant 0 : i32
    return %arg0, %c0_i32, %c0_i32_0 : i32, i32, i32
  }
  func.func @transform_1(%arg0: i32) -> (i32, i32) {
    %c0_i32 = arith.constant 0 : i32
    %c0_i32_0 = arith.constant 0 : i32
    return %arg0, %c0_i32 : i32, i32
  }
  func.func @transform_2(%arg0: i32) -> (i32, i32) {
    %c0_i32 = arith.constant 0 : i32
    %c0_i32_0 = arith.constant 0 : i32
    %c0_i32_1 = arith.constant 0 : i32
    return %c0_i32, %c0_i32_0 : i32, i32
  }
  func.func @transform_3(%arg0: i32) -> (i32, i32) {
    %c0_i32 = arith.constant 0 : i32
    %c0_i32_0 = arith.constant 0 : i32
    return %arg0, %c0_i32 : i32, i32
  }
  func.func @transform_4(%arg0: i32) -> (i32, i32) {
    %c0_i32 = arith.constant 0 : i32
    %c0_i32_0 = arith.constant 0 : i32
    return %arg0, %c0_i32 : i32, i32
  }
}

</mosaic_0001>

<bundles_post_ra>
// kernel: tpu_custom_call.1
= control target key start
LH: loop header
LB: loop body
LE: loop exit
PB: predicated region body
PF: predicated region fallthrough
CT: control target
= control target key end

     0   :  { %10 = vsyncpa [#allocation3], 0  ;;  %s406_s0 = inlined_call_operand.hbm [shape: f32[2,8,32], index: 0, kind: input, shape index: {}]   ;;  %s407_s1 = inlined_call_operand.vmem [shape: f32[2,8], index: 1, kind: input, shape index: {}]   ;;  %s408_s2 = inlined_call_operand.vmem [shape: f32[1,32], index: 2, kind: input, shape index: {}]   ;;  %s409_s3 = inlined_call_operand.hbm [shape: f32[2,32], index: 3, kind: output, shape index: {0}]   ;;  %s410_s4 = inlined_call_operand.hbm [shape: f32[2,8], index: 4, kind: output, shape index: {1}]  }
   0x1   :  { %11 = vsyncpa [#allocation4], 0 }
   0x2   :  { %12 = vsyncpa [#allocation7], 0  ;;  %s306_s15 = smov [#allocation2]   ;;  %s234_s19 = scalar_lea.hbm %s406_s0, 256 }
   0x3   :  { %s18_s16 = sshll.u32 %s306_s15, 4  ;;  %p235_p0 = scmp.ne.s32.totalorder %s406_s0, %s234_s19  ;;  %s19_s16 = int_to_ptr.vmem [resolvable:$true] %s18_s16 }
   0x4   :  { %p238_p1 = scmp.lt.u32.totalorder %s234_s19, %s406_s0 }
   0x6   :  { %p240_p2 = pnand %p238_p1, %p235_p0 }
   0x8   :  { %243 = shalt.err (!%p240_p2)
}
   0x9   :  { %s244_s24 = scalar_lea.vmem %s19_s16, 256  ;;  %p249_p4 = scmp.lt.s32.totalorder %s19_s16, %s19_s16 }
   0xa   :  { %p245_p3 = scmp.ne.s32.totalorder %s19_s16, %s244_s24  ;;  %p250_p5 = scmp.lt.s32.totalorder %s244_s24, %s244_s24 }
   0xc   :  { %p251_p6 = por %p250_p5, %p249_p4 }
   0xe   :  { %p252_p7 = pnand %p251_p6, %p245_p3 }
  0x10   :  { %255 = shalt.err (!%p252_p7)
}
  0x11   :  { %s307_s25 = smov 128   ;;  %s308_s26 = smov 8  }
  0x12   :  { %24 = dma.hbm_to_vmem [thread:$0]  %s406_s0, 256, %s19_s16, [#allocation3], %s307_s25, %s307_s25, %s308_s26  }
  0x13   :  { %300 = dma.done.wait [#allocation3], 256  }
  0x14   :  { %301 = vsyncadd [#allocation3], 4294967040  ;;  %v52_v0 = vlaneseq  ;;  %v219_v5 = vld [vmem:[%s408_s2] ss:$0 sm:$0xff]  ;;  %vm44_vm0 = vcmask 261120   ;;  %v356_v7 = vld [vmem:[#allocation2 + $0x8] sm:$0xff] }
  0x15   :  { %v354_v6 = vld [vmem:[#allocation2] sm:$0xff]  ;;  %v43_v10 = vmul.f32 %v219_v5, %v356_v7  ;;  %v309_v16 = vmov 0   ;;  %vm88_vm1 = vcmask 1041409   ;;  %vm91_vm2 = vcmask 58368  }
  0x16   :  { %v53_v1 = vshrl.u32 %v52_v0, 7  ;;  %v79_v2 = vand.u32 127, %v52_v0  ;;  %v42_v9 = vmul.f32 %v219_v5, %v354_v6  ;;  %v32_v11 = vld [vmem:[%s407_s1] sm:$0x3]  ;;  %226 = vset.pattern.permute.xlu0 %v309_v16  ;;  %227 = vset.pattern.permute.xlu1 %v309_v16  ;;  %s310_s1 = smov [#allocation6]  }
  0x17   :  { %v48_v15 = vsel %vm44_vm0, %v43_v10, 0.0  ;;  %s206_s2 = sshll.u32 %s310_s1, 4  ;;  %s207_s2 = int_to_ptr.vmem [resolvable:$true] %s206_s2 }
  0x18   :  { %v349_v3 = vsub.s32 %v79_v2, %v53_v1  ;;  %v54_v4 = vsub.s32 0, %v53_v1  ;;  %v61_v8 = vsub.s32 1, %v53_v1  ;;  %v45_v13 = vsel %vm44_vm0, %v42_v9, 0.0  ;;  %s256_s6 = scalar_lea.vmem %s207_s2, 32  ;;  %p261_p9 = scmp.lt.s32.totalorder %s207_s2, %s207_s2 }
  0x19   :  { %46 = vadd.xlane.f32.xlu0 %v45_v13  ;;  %p257_p8 = scmp.ne.s32.totalorder %s207_s2, %s256_s6  ;;  %p262_p10 = scmp.lt.s32.totalorder %s256_s6, %s256_s6 }
  0x1a   :  { %v55_v12 = vrot.slane %v32_v11, %v54_v4  ;;  %v62_v14 = vrot.slane %v32_v11, %v61_v8 }
  0x1b   :  { %p263_p11 = por %p262_p10, %p261_p9 }
  0x1c   :  { %57 = vbcast.lane.b32.xlu1 %v55_v12, 256 }
  0x1d   :  { %49 = vadd.xlane.f32.xlu0 %v48_v15  ;;  %p264_p12 = pnand %p263_p11, %p257_p8 }
  0x20   :  { %64 = vbcast.lane.b32.xlu1 %v62_v14, 256 }
  0x8e   :  { %v58_v17 = vpop.permute.xlu1 %57 }
  0x92   :  { %v65_v20 = vpop.permute.xlu1 %64 }
  0xa6   :  { %v47_v18 = vpop.xlane.xlu0 %46 }
  0xa7   :  { %v68_v19 = vsub.f32 %v47_v18, %v58_v17 }
  0xa9   :  { %73 = vperm.xlu0 %226, %v68_v19  }
  0xaa   :  { %v50_v21 = vpop.xlane.xlu0 %49 }
  0xab   :  { %v69_v22 = vsub.f32 %v50_v21, %v65_v20 }
  0xad   :  { %76 = vperm.xlu1 %227, %v69_v22  }
 0x128   :  { %v74_v23 = vpop.permute.xlu0 %73 }
 0x129   :  { %v83_v25 = vrot.slane %v74_v23, %v349_v3 }
 0x12c   :  { %v77_v24 = vpop.permute.xlu1 %76 }
 0x12d   :  { %v87_v26 = vrot.slane %v77_v24, %v349_v3 }
 0x12f   :  { %v89_v27 = vsel %vm88_vm1, %v87_v26, %v83_v25 }
 0x130   :  { %v92_v28 = vsel %vm91_vm2, %v89_v27, -inf }
 0x131   :  { %93 = vmax.xlane.f32.xlu1 %v92_v28 }
 0x1be   :  { %v94_v29 = vpop.xlane.xlu1 %93 }
 0x1bf   :  { %v99_v30 = vrot.slane %v94_v29, %v54_v4  ;;  %v103_v31 = vrot.slane %v94_v29, %v61_v8 }
 0x1c1   :  { %v106_v32 = vsub.f32 %v68_v19, %v99_v30  ;;  %v107_v33 = vsub.f32 %v69_v22, %v103_v31 }
 0x1c3   :  { %v108_v34 = vmul.f32 1.442695, %v106_v32  ;;  %v110_v35 = vmul.f32 1.442695, %v107_v33 }
 0x1c5   :  { %228 = vpow2.f32 %v108_v34 }
 0x1c6   :  { %230 = vpow2.f32 %v110_v35 }
 0x1cf   :  { %v229_v36 = vpop.eup %228 }
 0x1d0   :  { %v231_v37 = vpop.eup %230  ;;  %115 = vperm.xlu1 %227, %v229_v36  }
 0x1d1   :  { %118 = vperm.xlu0 %226, %v231_v37  }
 0x24f   :  { %v116_v38 = vpop.permute.xlu1 %115 }
 0x250   :  { %v119_v39 = vpop.permute.xlu0 %118  ;;  %v123_v40 = vrot.slane %v116_v38, %v349_v3 }
 0x251   :  { %v127_v41 = vrot.slane %v119_v39, %v349_v3 }
 0x253   :  { %v128_v42 = vsel %vm88_vm1, %v127_v41, %v123_v40 }
 0x254   :  { %v130_v43 = vsel %vm91_vm2, %v128_v42, 0.0 }
 0x255   :  { %131 = vadd.xlane.f32.xlu0 %v130_v43 }
 0x2e2   :  { %v132_v44 = vpop.xlane.xlu0 %131 }
 0x2e3   :  { %232 = vrcp.f32 %v132_v44 }
 0x2ed   :  { %v233_v45 = vpop.eup %232 }
 0x2ee   :  { %v138_v46 = vrot.slane %v233_v45, %v54_v4  ;;  %v142_v48 = vrot.slane %v233_v45, %v61_v8 }
 0x2f0   :  { %v145_v47 = vmul.f32 %v229_v36, %v138_v46  ;;  %v146_v49 = vmul.f32 %v231_v37, %v142_v48 }
 0x2f2   :  { %149 = vperm.xlu1 %227, %v145_v47  }
 0x2f6   :  { %154 = vperm.xlu1 %227, %v146_v49  }
 0x371   :  { %v150_v50 = vpop.permute.xlu1 %149 }
 0x372   :  { %v157_v51 = vmul.f32 %v150_v50, %v354_v6  ;;  %v182_v55 = vrot.slane %v150_v50, %v349_v3 }
 0x374   :  { %v159_v52 = vsel %vm44_vm0, %v157_v51, 0.0 }
 0x375   :  { %v160_v53 = vrot.slane %v159_v52, 4  ;;  %v155_v54 = vpop.permute.xlu1 %154 }
 0x376   :  { %v158_v56 = vmul.f32 %v155_v54, %v356_v7  ;;  %v186_v57 = vrot.slane %v155_v54, %v349_v3 }
 0x377   :  { %v161_v58 = vadd.f32 %v160_v53, %v159_v52 }
 0x378   :  { %v166_v59 = vsel %vm44_vm0, %v158_v56, 0.0  ;;  %v187_v60 = vsel %vm88_vm1, %v186_v57, %v182_v55 }
 0x379   :  { %v162_v61 = vrot.slane %v161_v58, 2  ;;  %v167_v62 = vrot.slane %v166_v59, 4  ;;  %189 = vst.msk [vmem:[#allocation6] sm:$0x3] %vm91_vm2, %v187_v60 }
 0x37a   :  { %267 = shalt.err (!%p264_p12)
}
 0x37b   :  { %s268_s9 = scalar_lea.hbm %s410_s4, 32 }
 0x37c   :  { %p269_p13 = scmp.ne.s32.totalorder %s410_s4, %s268_s9  ;;  %p272_p0 = scmp.lt.u32.totalorder %s268_s9, %s410_s4 }
 0x37e   :  { %p274_p1 = pnand %p272_p0, %p269_p13 }
 0x380   :  { %277 = shalt.err (!%p274_p1)
}
 0x381   :  { %209 = dma.vmem_to_hbm [thread:$0]  %s207_s2, 32, %s410_s4, [#allocation7]   ;;  %v163_v63 = vadd.f32 %v162_v61, %v161_v58  ;;  %v168_v0 = vadd.f32 %v167_v62, %v166_v59  ;;  %vm177_vm3 = vcmask 254976  }
 0x382   :  { %s311_s16 = smov [#allocation5]  }
 0x383   :  { %v169_v1 = vrot.slane %v168_v0, 2  ;;  %v164_v2 = vrot.slane %v163_v63, 1  ;;  %s196_s17 = sshll.u32 %s311_s16, 4  ;;  %s197_s17 = int_to_ptr.vmem [resolvable:$true] %s196_s17 }
 0x384   :  { %s278_s18 = scalar_lea.vmem %s197_s17, 32  ;;  %p283_p3 = scmp.lt.s32.totalorder %s197_s17, %s197_s17 }
 0x385   :  { %v170_v3 = vadd.f32 %v169_v1, %v168_v0  ;;  %v165_v6 = vadd.f32 %v164_v2, %v163_v63  ;;  %p279_p2 = scmp.ne.s32.totalorder %s197_s17, %s278_s18  ;;  %p284_p4 = scmp.lt.s32.totalorder %s278_s18, %s278_s18 }
 0x387   :  { %v171_v4 = vrot.slane %v170_v3, 1  ;;  %p285_p5 = por %p284_p4, %p283_p3 }
 0x389   :  { %v172_v5 = vadd.f32 %v171_v4, %v170_v3  ;;  %p286_p6 = pnand %p285_p5, %p279_p2 }
 0x38b   :  { %v175_v7 = vsel %vm88_vm1, %v172_v5, %v165_v6 }
 0x38c   :  { %178 = vst.msk [vmem:[#allocation5] sm:$0x3] %vm177_vm3, %v175_v7 }
 0x38d   :  { %289 = shalt.err (!%p286_p6)
}
 0x38e   :  { %s290_s20 = scalar_lea.hbm %s409_s3, 32 }
 0x38f   :  { %p291_p7 = scmp.ne.s32.totalorder %s409_s3, %s290_s20  ;;  %p294_p8 = scmp.lt.u32.totalorder %s290_s20, %s409_s3 }
 0x391   :  { %p296_p9 = pnand %p294_p8, %p291_p7 }
 0x393   :  { %299 = shalt.err (!%p296_p9)
}
 0x394   :  { %199 = dma.vmem_to_hbm [thread:$0]  %s197_s17, 32, %s409_s3, [#allocation4]  }
 0x395   :  { %302 = dma.done.wait [#allocation4], 32  }
 0x396   :  { %303 = vsyncadd [#allocation4], 4294967264 }
 0x397   :  { %304 = dma.done.wait [#allocation7], 32  }
 0x398   :  { %305 = vsyncadd [#allocation7], 4294967264 }
 0x399   :  { %216 = vsyncpa [#allocation3], 1 }
 0x39a   :  { %217 = vsyncpa [#allocation4], 1 }
 0x39b   :  { %218 = vsyncpa [#allocation7], 1 }

</bundles_post_ra>
